<compile_context>
chip_gen: v5e
topology: v5e:2x2
jax: 0.10.0
libtpu: 0.0.40
codegen_flags: <defaults>
</compile_context>

<pallas_src>
import jax
import jax.numpy as jnp
from jax.experimental import pallas as pl
from jax.experimental.pallas import tpu as pltpu

NEG_SLOPE = 0.01           # nn.LeakyReLU default negative_slope
_ROW_TILE_MAX = 2048       # rows per grid step (few MiB of VMEM even at this size)
_SMALL_N_FALLBACK = 1024   # below this many rows, use plain-JAX path (launch overhead)


def _round_up(v, m):
    return ((v + m - 1) // m) * m


def _cdiv(a, b):
    return (a + b - 1) // b


# ---------------------------------------------------------------------------
# Fused reward-MLP kernel: all ensemble members in the lane dimension,
# both trajectories in the row dimension. One grid axis over row tiles.
#   [obs|act] @ [W1_obs;W1_act] -> LeakyReLU -> [Dropout=identity]
#   block-diag Linear(E*H1 -> E*H2) -> LeakyReLU -> [Dropout=identity]
#   block-diag Linear(E*H2 -> E*H3) -> LeakyReLU -> [Dropout=identity]
#   block-diag Linear(E*H3 -> E)
# Matmul operands bf16, accumulation + bias + activation f32.
# ---------------------------------------------------------------------------
def _fused_mlp_kernel(obs_ref, act_ref,
                      w1o_ref, w1a_ref, b1_ref,
                      w2_ref, b2_ref,
                      w3_ref, b3_ref,
                      w4_ref, b4_ref,
                      out_ref):
    h = (jnp.dot(obs_ref[...], w1o_ref[...], preferred_element_type=jnp.float32)
         + jnp.dot(act_ref[...], w1a_ref[...], preferred_element_type=jnp.float32)
         + b1_ref[...])                                                    # (T, E*H1) f32
    h = jnp.maximum(h, NEG_SLOPE * h)
    h = jnp.dot(h.astype(w2_ref.dtype), w2_ref[...],
                preferred_element_type=jnp.float32) + b2_ref[...]          # (T, E*H2)
    h = jnp.maximum(h, NEG_SLOPE * h)
    h = jnp.dot(h.astype(w3_ref.dtype), w3_ref[...],
                preferred_element_type=jnp.float32) + b3_ref[...]          # (T, E*H3)
    h = jnp.maximum(h, NEG_SLOPE * h)
    out_ref[...] = (jnp.dot(h.astype(w4_ref.dtype), w4_ref[...],
                            preferred_element_type=jnp.float32)
                    + b4_ref[...])                                         # (T, E)


def _choose_row_tile(total):
    """Aim for >=2 grid steps (v7x megacore), cap the tile at _ROW_TILE_MAX,
    round to the bf16 sublane pack (16), minimize padding waste."""
    n_steps = max(2, _cdiv(total, _ROW_TILE_MAX))
    tile = _round_up(_cdiv(total, n_steps), 16)
    return min(tile, _round_up(total, 16))


def _jax_rewards(obs2d, act2d, fused):
    """Small-N fallback: identical math (bf16 operands, f32 accumulation) in plain jnp."""
    h = (jnp.dot(obs2d.astype(jnp.bfloat16), fused["w1_obs"],
                 preferred_element_type=jnp.float32)
         + jnp.dot(act2d.astype(jnp.bfloat16), fused["w1_act"],
                   preferred_element_type=jnp.float32)
         + fused["b1"])
    h = jnp.maximum(h, NEG_SLOPE * h)
    h = jnp.dot(h.astype(jnp.bfloat16), fused["w2"],
                preferred_element_type=jnp.float32) + fused["b2"]
    h = jnp.maximum(h, NEG_SLOPE * h)
    h = jnp.dot(h.astype(jnp.bfloat16), fused["w3"],
                preferred_element_type=jnp.float32) + fused["b3"]
    h = jnp.maximum(h, NEG_SLOPE * h)
    return (jnp.dot(h.astype(jnp.bfloat16), fused["w4"],
                    preferred_element_type=jnp.float32) + fused["b4"])


def ensemble_rewards(obs2d, act2d, fused, use_pallas=None):
    """obs2d: (rows, obs_dim) f32, act2d: (rows, act_dim) f32.
    fused: dict of lane-packed bf16 weights + f32 biases. Returns (rows, E) f32."""
    total, obs_dim = obs2d.shape
    act_dim = act2d.shape[1]
    if use_pallas is None:
        use_pallas = total >= _SMALL_N_FALLBACK
    if not use_pallas:
        return _jax_rewards(obs2d, act2d, fused)

    EH1 = fused["w1_obs"].shape[1]
    EH2 = fused["w2"].shape[1]
    EH3 = fused["w3"].shape[1]
    E = fused["w4"].shape[1]

    row_tile = _choose_row_tile(total)
    padded = _round_up(total, row_tile)

    obs_b = obs2d.astype(jnp.bfloat16)
    act_b = act2d.astype(jnp.bfloat16)
    if padded != total:
        obs_b = jnp.pad(obs_b, ((0, padded - total), (0, 0)))
        act_b = jnp.pad(act_b, ((0, padded - total), (0, 0)))
    grid = (padded // row_tile,)

    out = pl.pallas_call(
        _fused_mlp_kernel,
        out_shape=jax.ShapeDtypeStruct((padded, E), jnp.float32),
        grid=grid,
        in_specs=[
            pl.BlockSpec((row_tile, obs_dim), lambda i: (i, 0)),   # obs (row-tiled)
            pl.BlockSpec((row_tile, act_dim), lambda i: (i, 0)),   # act (row-tiled)
            pl.BlockSpec((obs_dim, EH1), lambda i: (0, 0)),        # w1_obs (resident)
            pl.BlockSpec((act_dim, EH1), lambda i: (0, 0)),        # w1_act
            pl.BlockSpec((1, EH1), lambda i: (0, 0)),              # b1
            pl.BlockSpec((EH1, EH2), lambda i: (0, 0)),            # w2 (block-diag)
            pl.BlockSpec((1, EH2), lambda i: (0, 0)),              # b2
            pl.BlockSpec((EH2, EH3), lambda i: (0, 0)),            # w3 (block-diag)
            pl.BlockSpec((1, EH3), lambda i: (0, 0)),              # b3
            pl.BlockSpec((EH3, E), lambda i: (0, 0)),              # w4 (block-diag)
            pl.BlockSpec((1, E), lambda i: (0, 0)),                # b4
        ],
        out_specs=pl.BlockSpec((row_tile, E), lambda i: (i, 0)),
        compiler_params=pltpu.CompilerParams(
            dimension_semantics=("parallel",)),
    )(obs_b, act_b,
      fused["w1_obs"], fused["w1_act"], fused["b1"],
      fused["w2"], fused["b2"],
      fused["w3"], fused["b3"],
      fused["w4"], fused["b4"])
    return out[:total]


# ---------------------------------------------------------------------------
# Pack per-member (E, fan_in, fan_out) weights into lane-fused / block-diagonal form.
# Call ONCE outside the jitted forward (hoisted out of the per-call path).
# ---------------------------------------------------------------------------
def _block_diag(blocks, dtype):
    e = len(blocks)
    r, c = blocks[0].shape
    out = jnp.zeros((e * r, e * c), dtype=dtype)
    for i, blk in enumerate(blocks):
        out = out.at[i * r:(i + 1) * r, i * c:(i + 1) * c].set(blk.astype(dtype))
    return out


def fuse_ensemble_params(params, obs_dim, matmul_dtype=jnp.bfloat16):
    E, D, H1 = params["w1"].shape
    H2 = params["w2"].shape[2]
    H3 = params["w3"].shape[2]

    # column order is (member-major, hidden-minor) for every layer
    w1 = jnp.transpose(params["w1"], (1, 0, 2)).reshape(D, E * H1).astype(matmul_dtype)
    fused = {
        "w1_obs": w1[:obs_dim],                                            # (obs_dim, E*H1)
        "w1_act": w1[obs_dim:],                                            # (act_dim, E*H1)
        "b1": params["b1"].reshape(1, E * H1).astype(jnp.float32),
        "w2": _block_diag([params["w2"][e] for e in range(E)], matmul_dtype),  # (E*H1, E*H2)
        "b2": params["b2"].reshape(1, E * H2).astype(jnp.float32),
        "w3": _block_diag([params["w3"][e] for e in range(E)], matmul_dtype),  # (E*H2, E*H3)
        "b3": params["b3"].reshape(1, E * H3).astype(jnp.float32),
        "w4": _block_diag([params["w4"][e] for e in range(E)], matmul_dtype),  # (E*H3, E)
        "b4": params["b4"].reshape(1, E).astype(jnp.float32),
    }
    return fused


# ---------------------------------------------------------------------------
# Glue: PreferenceModel.forward (takes the pre-fused weight dict)
# ---------------------------------------------------------------------------
def preference_model_forward(fused, first_obs, first_acts, second_obs, second_acts,
                             force_pallas=None):
    B, F, obs_dim = first_obs.shape
    act_dim = first_acts.shape[-1]
    N = B * F
    E = fused["w4"].shape[1]

    # Both trajectories through one launch: rows = 2N. obs/act stay separate
    # (W1 is split), avoiding a feature-dim concat + HBM round trip.
    obs = jnp.concatenate([first_obs, second_obs], axis=0).reshape(2 * N, obs_dim)
    acts = jnp.concatenate([first_acts, second_acts], axis=0).reshape(2 * N, act_dim)

    r = ensemble_rewards(obs.astype(jnp.float32), acts.astype(jnp.float32),
                         fused, use_pallas=force_pallas)            # (2N, E) f32
    first_rews = r[:N].reshape(B, F, E)
    second_rews = r[N:].reshape(B, F, E)

    # Bradley-Terry preference probs: tiny (B*E*2 floats) -> plain JAX, no kernel.
    s1 = jnp.sum(first_rews, axis=1)                                # (B, E)
    s2 = jnp.sum(second_rews, axis=1)                               # (B, E)
    probs = jax.nn.softmax(jnp.stack([s1, s2], axis=-1), axis=-1)   # (B, E, 2)
    return first_rews, second_rews, probs


# ---------------------------------------------------------------------------
# Deterministic parameter init (PyTorch Linear default: U(-1/sqrt(fan_in), ..))
# ---------------------------------------------------------------------------
def init_params(key, obs_dim, act_dim, hidden_dims, ensemble_size):
    dims = [obs_dim + act_dim] + list(hidden_dims) + [1]
    params = {}
    for li in range(len(dims) - 1):
        fan_in, fan_out = dims[li], dims[li + 1]
        key, kw, kb = jax.random.split(key, 3)
        bound = float(1.0 / (fan_in ** 0.5))
        params[f"w{li+1}"] = jax.random.uniform(
            kw, (ensemble_size, fan_in, fan_out), jnp.float32, -bound, bound)
        params[f"b{li+1}"] = jax.random.uniform(
            kb, (ensemble_size, 1, fan_out), jnp.float32, -bound, bound)
    return params


# ---------------------------------------------------------------------------
# Pure-JAX f32 reference (correctness check vs. unfused per-member weights)
# ---------------------------------------------------------------------------
def _ref_forward(params, first_obs, first_acts, second_obs, second_acts):
    E = params["w1"].shape[0]

    def mlp(x, e):
        h = x
        for li in range(1, 5):
            w = params[f"w{li}"][e]
            b = params[f"b{li}"][e][0]
            h = h @ w + b
            if li < 4:
                h = jnp.where(h > 0, h, NEG_SLOPE * h)
        return h[..., 0]                                     # (B, F)

    x1 = jnp.concatenate([first_obs, first_acts], axis=-1)
    x2 = jnp.concatenate([second_obs, second_acts], axis=-1)
    r1 = jnp.stack([mlp(x1, e) for e in range(E)], axis=-1)  # (B, F, E)
    r2 = jnp.stack([mlp(x2, e) for e in range(E)], axis=-1)
    s = jnp.stack([r1.sum(axis=1), r2.sum(axis=1)], axis=-1)  # (B, E, 2)
    probs = jax.nn.softmax(s, axis=-1)
    return r1, r2, probs


if __name__ == "__main__":
    key = jax.random.PRNGKey(0)
    B, F = 2, 8
    obs_dim, act_dim = 11, 5
    hidden_dims = [64, 64, 64]
    ensemble_size = 3

    kp, k1, k2, k3, k4 = jax.random.split(key, 5)
    params = init_params(kp, obs_dim, act_dim, hidden_dims, ensemble_size)

    # Weight fusion hoisted out of the forward: done ONCE here, outside jit.
    fused = fuse_ensemble_params(params, obs_dim)

    first_obs = jax.random.normal(k1, (B, F, obs_dim), jnp.float32)
    first_acts = jax.random.normal(k2, (B, F, act_dim), jnp.float32)
    second_obs = jax.random.normal(k3, (B, F, obs_dim), jnp.float32)
    second_acts = jax.random.normal(k4, (B, F, act_dim), jnp.float32)

    fwd = jax.jit(preference_model_forward, static_argnames=("force_pallas",))

    # 1) Pallas path, forced on so the kernel is exercised even at this small N.
    first_rews, second_rews, probs = fwd(
        fused, first_obs, first_acts, second_obs, second_acts, force_pallas=True)
    jax.block_until_ready((first_rews, second_rews, probs))

    # 2) Auto-dispatch path (small-N -> plain-JAX fallback with identical math).
    r1_fb, r2_fb, probs_fb = fwd(fused, first_obs, first_acts, second_obs, second_acts)
    jax.block_until_ready((r1_fb, r2_fb, probs_fb))

    # Correctness checks.
    r1_ref, r2_ref, probs_ref = _ref_forward(
        params, first_obs, first_acts, second_obs, second_acts)
    assert first_rews.shape == (B, F, ensemble_size)
    assert second_rews.shape == (B, F, ensemble_size)
    assert probs.shape == (B, ensemble_size, 2)
    # bf16 matmul operands (f32 accumulation) vs f32 reference -> loose tolerance.
    assert jnp.allclose(first_rews, r1_ref, atol=5e-2, rtol=5e-2)
    assert jnp.allclose(second_rews, r2_ref, atol=5e-2, rtol=5e-2)
    assert jnp.allclose(probs, probs_ref, atol=5e-2, rtol=5e-2)
    # Pallas path vs identical-math jnp fallback -> tight tolerance.
    assert jnp.allclose(first_rews, r1_fb, atol=2e-3, rtol=2e-3)
    assert jnp.allclose(second_rews, r2_fb, atol=2e-3, rtol=2e-3)
    assert jnp.allclose(probs, probs_fb, atol=2e-3, rtol=2e-3)

    print("KERNEL_OK")
</pallas_src>

<mosaic_0001>
module attributes {stable_mosaic.version = 11 : i64} {
  func.func @_fused_mlp_kernel(%arg0: i32, %arg1: memref<16x11xbf16, #tpu.memory_space<vmem>>, %arg2: memref<16x5xbf16, #tpu.memory_space<vmem>>, %arg3: memref<11x192xbf16, #tpu.memory_space<vmem>>, %arg4: memref<5x192xbf16, #tpu.memory_space<vmem>>, %arg5: memref<1x192xf32, #tpu.memory_space<vmem>>, %arg6: memref<192x192xbf16, #tpu.memory_space<vmem>>, %arg7: memref<1x192xf32, #tpu.memory_space<vmem>>, %arg8: memref<192x192xbf16, #tpu.memory_space<vmem>>, %arg9: memref<1x192xf32, #tpu.memory_space<vmem>>, %arg10: memref<192x3xbf16, #tpu.memory_space<vmem>>, %arg11: memref<1x3xf32, #tpu.memory_space<vmem>>, %arg12: memref<16x3xf32, #tpu.memory_space<vmem>>) attributes {dimension_semantics = [#tpu.dimension_semantics<parallel>], iteration_bounds = array<i64: 2>, scalar_prefetch = 0 : i64, scratch_operands = 0 : i64, tpu.core_type = #tpu.core_type<tc>, window_params = [{transform_indices = @transform_0, window_bounds = array<i64: 16, 11>}, {transform_indices = @transform_1, window_bounds = array<i64: 16, 5>}, {pipeline_mode = #tpu.pipeline_mode<synchronous>, transform_indices = @transform_2, window_bounds = array<i64: 11, 192>}, {pipeline_mode = #tpu.pipeline_mode<synchronous>, transform_indices = @transform_3, window_bounds = array<i64: 5, 192>}, {pipeline_mode = #tpu.pipeline_mode<synchronous>, transform_indices = @transform_4, window_bounds = array<i64: 1, 192>}, {pipeline_mode = #tpu.pipeline_mode<synchronous>, transform_indices = @transform_5, window_bounds = array<i64: 192, 192>}, {pipeline_mode = #tpu.pipeline_mode<synchronous>, transform_indices = @transform_6, window_bounds = array<i64: 1, 192>}, {pipeline_mode = #tpu.pipeline_mode<synchronous>, transform_indices = @transform_7, window_bounds = array<i64: 192, 192>}, {pipeline_mode = #tpu.pipeline_mode<synchronous>, transform_indices = @transform_8, window_bounds = array<i64: 1, 192>}, {pipeline_mode = #tpu.pipeline_mode<synchronous>, transform_indices = @transform_9, window_bounds = array<i64: 192, 3>}, {pipeline_mode = #tpu.pipeline_mode<synchronous>, transform_indices = @transform_10, window_bounds = array<i64: 1, 3>}, {transform_indices = @transform_11, window_bounds = array<i64: 16, 3>}]} {
    %c0 = arith.constant 0 : index
    %c0_0 = arith.constant 0 : index
    %0 = vector.load %arg1[%c0, %c0_0] : memref<16x11xbf16, #tpu.memory_space<vmem>>, vector<16x11xbf16>
    %c0_1 = arith.constant 0 : index
    %c0_2 = arith.constant 0 : index
    %1 = vector.load %arg3[%c0_1, %c0_2] : memref<11x192xbf16, #tpu.memory_space<vmem>>, vector<11x192xbf16>
    %cst = arith.constant dense<0.000000e+00> : vector<16x192xf32>
    %2 = tpu.matmul %0, %1, %cst {dimension_numbers = #tpu.dot_dimension_numbers<[1], [0], [0], [1], [0, 0, 1, 1], [], []>} : vector<16x11xbf16>, vector<11x192xbf16>, vector<16x192xf32> -> vector<16x192xf32>
    %c0_3 = arith.constant 0 : index
    %c0_4 = arith.constant 0 : index
    %3 = vector.load %arg2[%c0_3, %c0_4] : memref<16x5xbf16, #tpu.memory_space<vmem>>, vector<16x5xbf16>
    %c0_5 = arith.constant 0 : index
    %c0_6 = arith.constant 0 : index
    %4 = vector.load %arg4[%c0_5, %c0_6] : memref<5x192xbf16, #tpu.memory_space<vmem>>, vector<5x192xbf16>
    %cst_7 = arith.constant dense<0.000000e+00> : vector<16x192xf32>
    %5 = tpu.matmul %3, %4, %cst_7 {dimension_numbers = #tpu.dot_dimension_numbers<[1], [0], [0], [1], [0, 0, 1, 1], [], []>} : vector<16x5xbf16>, vector<5x192xbf16>, vector<16x192xf32> -> vector<16x192xf32>
    %6 = arith.addf %2, %5 : vector<16x192xf32>
    %c0_8 = arith.constant 0 : index
    %c0_9 = arith.constant 0 : index
    %7 = vector.load %arg5[%c0_8, %c0_9] : memref<1x192xf32, #tpu.memory_space<vmem>>, vector<1x192xf32>
    %8 = vector.broadcast %7 : vector<1x192xf32> to vector<16x192xf32>
    %9 = arith.addf %6, %8 : vector<16x192xf32>
    %cst_10 = arith.constant 0.00999999977 : f32
    %10 = vector.broadcast %cst_10 : f32 to vector<16x192xf32>
    %11 = arith.mulf %10, %9 : vector<16x192xf32>
    %12 = arith.maximumf %9, %11 : vector<16x192xf32>
    %13 = arith.truncf %12 : vector<16x192xf32> to vector<16x192xbf16>
    %c0_11 = arith.constant 0 : index
    %c0_12 = arith.constant 0 : index
    %14 = vector.load %arg6[%c0_11, %c0_12] : memref<192x192xbf16, #tpu.memory_space<vmem>>, vector<192x192xbf16>
    %cst_13 = arith.constant dense<0.000000e+00> : vector<16x192xf32>
    %15 = tpu.matmul %13, %14, %cst_13 {dimension_numbers = #tpu.dot_dimension_numbers<[1], [0], [0], [1], [0, 0, 1, 1], [], []>} : vector<16x192xbf16>, vector<192x192xbf16>, vector<16x192xf32> -> vector<16x192xf32>
    %c0_14 = arith.constant 0 : index
    %c0_15 = arith.constant 0 : index
    %16 = vector.load %arg7[%c0_14, %c0_15] : memref<1x192xf32, #tpu.memory_space<vmem>>, vector<1x192xf32>
    %17 = vector.broadcast %16 : vector<1x192xf32> to vector<16x192xf32>
    %18 = arith.addf %15, %17 : vector<16x192xf32>
    %cst_16 = arith.constant 0.00999999977 : f32
    %19 = vector.broadcast %cst_16 : f32 to vector<16x192xf32>
    %20 = arith.mulf %19, %18 : vector<16x192xf32>
    %21 = arith.maximumf %18, %20 : vector<16x192xf32>
    %22 = arith.truncf %21 : vector<16x192xf32> to vector<16x192xbf16>
    %c0_17 = arith.constant 0 : index
    %c0_18 = arith.constant 0 : index
    %23 = vector.load %arg8[%c0_17, %c0_18] : memref<192x192xbf16, #tpu.memory_space<vmem>>, vector<192x192xbf16>
    %cst_19 = arith.constant dense<0.000000e+00> : vector<16x192xf32>
    %24 = tpu.matmul %22, %23, %cst_19 {dimension_numbers = #tpu.dot_dimension_numbers<[1], [0], [0], [1], [0, 0, 1, 1], [], []>} : vector<16x192xbf16>, vector<192x192xbf16>, vector<16x192xf32> -> vector<16x192xf32>
    %c0_20 = arith.constant 0 : index
    %c0_21 = arith.constant 0 : index
    %25 = vector.load %arg9[%c0_20, %c0_21] : memref<1x192xf32, #tpu.memory_space<vmem>>, vector<1x192xf32>
    %26 = vector.broadcast %25 : vector<1x192xf32> to vector<16x192xf32>
    %27 = arith.addf %24, %26 : vector<16x192xf32>
    %cst_22 = arith.constant 0.00999999977 : f32
    %28 = vector.broadcast %cst_22 : f32 to vector<16x192xf32>
    %29 = arith.mulf %28, %27 : vector<16x192xf32>
    %30 = arith.maximumf %27, %29 : vector<16x192xf32>
    %31 = arith.truncf %30 : vector<16x192xf32> to vector<16x192xbf16>
    %c0_23 = arith.constant 0 : index
    %c0_24 = arith.constant 0 : index
    %32 = vector.load %arg10[%c0_23, %c0_24] : memref<192x3xbf16, #tpu.memory_space<vmem>>, vector<192x3xbf16>
    %cst_25 = arith.constant dense<0.000000e+00> : vector<16x3xf32>
    %33 = tpu.matmul %31, %32, %cst_25 {dimension_numbers = #tpu.dot_dimension_numbers<[1], [0], [0], [1], [0, 0, 1, 1], [], []>} : vector<16x192xbf16>, vector<192x3xbf16>, vector<16x3xf32> -> vector<16x3xf32>
    %c0_26 = arith.constant 0 : index
    %c0_27 = arith.constant 0 : index
    %34 = vector.load %arg11[%c0_26, %c0_27] : memref<1x3xf32, #tpu.memory_space<vmem>>, vector<1x3xf32>
    %35 = vector.broadcast %34 : vector<1x3xf32> to vector<16x3xf32>
    %36 = arith.addf %33, %35 : vector<16x3xf32>
    %c0_28 = arith.constant 0 : index
    %c0_29 = arith.constant 0 : index
    %37 = vector.load %arg12[%c0_28, %c0_29] : memref<16x3xf32, #tpu.memory_space<vmem>>, vector<16x3xf32>
    tpu.vector_store %arg12[%c0_28, %c0_29], %36 {strides = array<i32>} : memref<16x3xf32, #tpu.memory_space<vmem>>, vector<16x3xf32>,
    return
  }
  func.func @transform_0(%arg0: i32) -> (i32, i32) {
    %c0_i32 = arith.constant 0 : i32
    %c0_i32_0 = arith.constant 0 : i32
    return %arg0, %c0_i32 : i32, i32
  }
  func.func @transform_1(%arg0: i32) -> (i32, i32) {
    %c0_i32 = arith.constant 0 : i32
    %c0_i32_0 = arith.constant 0 : i32
    return %arg0, %c0_i32 : i32, i32
  }
  func.func @transform_2(%arg0: i32) -> (i32, i32) {
    %c0_i32 = arith.constant 0 : i32
    %c0_i32_0 = arith.constant 0 : i32
    %c0_i32_1 = arith.constant 0 : i32
    return %c0_i32, %c0_i32_0 : i32, i32
  }
  func.func @transform_3(%arg0: i32) -> (i32, i32) {
    %c0_i32 = arith.constant 0 : i32
    %c0_i32_0 = arith.constant 0 : i32
    %c0_i32_1 = arith.constant 0 : i32
    return %c0_i32, %c0_i32_0 : i32, i32
  }
  func.func @transform_4(%arg0: i32) -> (i32, i32) {
    %c0_i32 = arith.constant 0 : i32
    %c0_i32_0 = arith.constant 0 : i32
    %c0_i32_1 = arith.constant 0 : i32
    return %c0_i32, %c0_i32_0 : i32, i32
  }
  func.func @transform_5(%arg0: i32) -> (i32, i32) {
    %c0_i32 = arith.constant 0 : i32
    %c0_i32_0 = arith.constant 0 : i32
    %c0_i32_1 = arith.constant 0 : i32
    return %c0_i32, %c0_i32_0 : i32, i32
  }
  func.func @transform_6(%arg0: i32) -> (i32, i32) {
    %c0_i32 = arith.constant 0 : i32
    %c0_i32_0 = arith.constant 0 : i32
    %c0_i32_1 = arith.constant 0 : i32
    return %c0_i32, %c0_i32_0 : i32, i32
  }
  func.func @transform_7(%arg0: i32) -> (i32, i32) {
    %c0_i32 = arith.constant 0 : i32
    %c0_i32_0 = arith.constant 0 : i32
    %c0_i32_1 = arith.constant 0 : i32
    return %c0_i32, %c0_i32_0 : i32, i32
  }
  func.func @transform_8(%arg0: i32) -> (i32, i32) {
    %c0_i32 = arith.constant 0 : i32
    %c0_i32_0 = arith.constant 0 : i32
    %c0_i32_1 = arith.constant 0 : i32
    return %c0_i32, %c0_i32_0 : i32, i32
  }
  func.func @transform_9(%arg0: i32) -> (i32, i32) {
    %c0_i32 = arith.constant 0 : i32
    %c0_i32_0 = arith.constant 0 : i32
    %c0_i32_1 = arith.constant 0 : i32
    return %c0_i32, %c0_i32_0 : i32, i32
  }
  func.func @transform_10(%arg0: i32) -> (i32, i32) {
    %c0_i32 = arith.constant 0 : i32
    %c0_i32_0 = arith.constant 0 : i32
    %c0_i32_1 = arith.constant 0 : i32
    return %c0_i32, %c0_i32_0 : i32, i32
  }
  func.func @transform_11(%arg0: i32) -> (i32, i32) {
    %c0_i32 = arith.constant 0 : i32
    %c0_i32_0 = arith.constant 0 : i32
    return %arg0, %c0_i32 : i32, i32
  }
}

</mosaic_0001>

<bundles_post_ra>
// kernel: preference_model_forward.1
= control target key start
LH: loop header
LB: loop body
LE: loop exit
PB: predicated region body
PF: predicated region fallthrough
CT: control target
= control target key end

     0   :  { %16 = vsyncpa [#allocation3], 0  ;;  %s1885_s0 = inlined_call_operand.vmem [shape: bf16[32,11], index: 0, kind: input, shape index: {}]   ;;  %s1886_s1 = inlined_call_operand.vmem [shape: bf16[32,5], index: 1, kind: input, shape index: {}]   ;;  %s1887_s2 = inlined_call_operand.vmem [shape: bf16[11,192], index: 2, kind: input, shape index: {}]   ;;  %s1888_s3 = inlined_call_operand.vmem [shape: bf16[5,192], index: 3, kind: input, shape index: {}]   ;;  %s1889_s4 = inlined_call_operand.vmem [shape: f32[1,192], index: 4, kind: input, shape index: {}]   ;;  %s1890_s5 = inlined_call_operand.hbm [shape: bf16[192,192], index: 5, kind: input, shape index: {}]   ;;  %s1891_s6 = inlined_call_operand.vmem [shape: f32[1,192], index: 6, kind: input, shape index: {}]   ;;  %s1892_s7 = inlined_call_operand.hbm [shape: bf16[192,192], index: 7, kind: input, shape index: {}]   ;;  %s1893_s8 = inlined_call_operand.vmem [shape: f32[1,192], index: 8, kind: input, shape index: {}]   ;;  %s1894_s9 = inlined_call_operand.vmem [shape: bf16[192,3], index: 9, kind: input, shape index: {}]   ;;  %s1895_s10 = inlined_call_operand.vmem [shape: f32[1,3], index: 10, kind: input, shape index: {}]   ;;  %s1896_s11 = inlined_call_operand.vmem [shape: f32[32,3], index: 11, kind: output, shape index: {}]  }
   0x1   :  { %17 = vsyncpa [#allocation5], 0  ;;  %s1764_s17 = smov 0  }
   0x2 LB: > { %s315_s20 = sshll.u32 %s1890_s5, 4  ;;  %s1244_s21 = sadd.s32 4294967295, %s1697_s17   ;;  %s1697_s17 = sphi %s1764_s17, %s23_s17   ;;  %s316_s20 = int_to_ptr.hbm [resolvable:$true] %s315_s20 }
   0x3   : > { %p1246_p0 = scmp.ge.s32.totalorder %s1697_s17, 1  ;;  %p295_p1 = scmp.lt.s32.totalorder %s1697_s17, 3 }
   0x4   : > { %p1775_p2 = scmp.eq.s32.totalorder %s1244_s21, 0  ;;  %s1699_s24 = smov [#allocation2]  }
   0x5   : > { %p1779_p3 = pnand %p1246_p0, %p295_p1  ;;  %s317_s25 = sshll.u32 %s1699_s24, 4  ;;  %s318_s25 = int_to_ptr.vmem [resolvable:$true] %s317_s25 }
   0x6   : > { %s332_s28 = sshll.u32 %s1892_s7, 4  ;;  %s1700_s29 = smov [#allocation4]   ;;  %s333_s28 = int_to_ptr.hbm [resolvable:$true] %s332_s28 }
   0x7   : > { %p1598_p4 = pneg %p1779_p3  ;;  %s334_s30 = sshll.u32 %s1700_s29, 4  ;;  %s335_s30 = int_to_ptr.vmem [resolvable:$true] %s334_s30 }
   0x8   : > { %s1701_s12 = smov 128   ;;  %s1702_s13 = smov 8  }
   0x9   : > { %p1599_p5 = pnand %p1775_p2, %p1598_p4  ;;  %377 = sbr.rel (%p1779_p3) target bundleno = 622 (0x26e), region = 64 }
   0xb   : > { %1601 = dma.hbm_to_vmem [thread:$0]  (!%p1599_p5), %s316_s20, 3072, %s318_s25, [#allocation3], %s1701_s12, %s1701_s12, %s1702_s13  }
   0xc   : > { %1604 = dma.hbm_to_vmem [thread:$0]  (!%p1599_p5), %s333_s28, 3072, %s335_s30, [#allocation5], %s1701_s12, %s1701_s12, %s1702_s13  }
   0xe   : > { %1688 = dma.done.wait (%p1775_p2), [#allocation3], 3072  }
   0xf   : > { %1690 = vsyncadd (%p1775_p2), [#allocation3], 4294964224 }
  0x10   : > { %1692 = dma.done.wait (%p1775_p2), [#allocation5], 3072  }
  0x11   : > { %1694 = vsyncadd (%p1775_p2), [#allocation5], 4294964224  ;;  %vm523_vm0 = vcmask 1044480   ;;  %s1253_s14 = sshll.u32 %s1244_s21, 1  ;;  %vm524_vm1 = vcmask 1045504   ;;  %v1703_v0 = vmov 65535  }
  0x12   : > { %p429_p6 = scmp.lt.s32.totalorder %s1253_s14, 3  ;;  %v525_v1 = vsel %vm523_vm0, 4294967295, %v1703_v0  ;;  %vm468_vm2 = vcmask 1041408   ;;  %vm469_vm3 = vcmask 1042432   ;;  %v1271_v4 = vld [vmem:[%s1887_s2] sm:$0xf] }
  0x13   : > { %v526_v2 = vsel %vm524_vm1, %v525_v1, 0  ;;  %v470_v3 = vsel %vm468_vm2, 4294967295, %v1703_v0  ;;  %v1528_v5 = vld [vmem:[%s1887_s2 + $0x4] sm:$0x30]  ;;  %v1527_v6 = vld [vmem:[%s1887_s2 + $0x4] sm:$0xf] }
  0x14   : > { %s1900_s14 = smov (!%p429_p6, %s1253_s14), 3  ;;  %v1272_v7 = vor.u32 %v1528_v5, %v1271_v4  ;;  %v1273_v8 = vld [vmem:[%s1887_s2 + $0x8] sm:$0x30]  ;;  %v453_v9 = vld [vmem:[%s1888_s3] sm:$0x77]  ;;  %v471_v16 = vsel %vm469_vm3, %v470_v3, 0 }
  0x15   : > { %s1254_s15 = sshll.u32 %s1900_s14, 2  ;;  %v1276_v10 = vor.u32 %v1527_v6, %v1273_v8  ;;  %v460_v11 = vunpack.c.l.b16 %v453_v9  ;;  %v461_v12 = vunpack.c.h.b16 %v453_v9  ;;  %v1337_v13 = vld [vmem:[#allocation2 + $0x70] sm:$0xf]  ;;  %v1545_v14 = vld [vmem:[#allocation2 + $0x74] sm:$0xf0]  ;;  %vm519_vm4 = vcmask 89088  }
  0x16   : > { %s432_s29 = scalar_lea.vmem %s1885_s0, %s1254_s15  ;;  %v528_v15 = vand.u32 %v1272_v7, %v526_v2  ;;  %v1544_v17 = vld [vmem:[#allocation2 + $0x74] sm:$0xf]  ;;  %v1339_v18 = vld [vmem:[#allocation2 + $0x78] sm:$0xf0]  ;;  %s438_s13 = scalar_lea.vmem %s1886_s1, %s1254_s15  ;;  %v1542_v23 = vld [vmem:[#allocation2 + $0x64] sm:$0xf]  ;;  %v1338_v26 = vor.u32 %v1545_v14, %v1337_v13 }
  0x17   : > { %v531_v19 = vand.u32 %v1276_v10, %v526_v2  ;;  %v462_v20 = vpack.c.b16 %v460_v11, %v460_v11  ;;  %v463_v21 = vpack.c.b16 %v461_v12, %v461_v12  ;;  %v1342_v22 = vor.u32 %v1544_v17, %v1339_v18  ;;  %v1331_v24 = vld [vmem:[#allocation2 + $0x68] sm:$0xf0]  ;;  %v1526_v25 = vld [vmem:[%s432_s29] sm:$0xff]  ;;  %v1543_v32 = vld [vmem:[#allocation2 + $0x64] sm:$0xf0]  ;;  %s1258_s12 = sshll.u32 %s1900_s14, 3 }
  0x18   : > { %540 = vmatpush.bf16.msra.mxu2 %v528_v15  ;;  %v1334_v29 = vor.u32 %v1542_v23, %v1331_v24  ;;  %v1529_v30 = vld [vmem:[%s438_s13] sm:$0xff]  ;;  %vm464_vm5 = vcmask 39936   ;;  %v1321_v34 = vld [vmem:[#allocation2 + $0x50] sm:$0xf]  ;;  %v1541_v35 = vld [vmem:[#allocation2 + $0x54] sm:$0xf0]  ;;  %s444_s16 = scalar_lea.vmem %s1896_s11, %s1258_s12 }
  0x19   : > { %554 = vmatpush.bf16.msra.mxu3 %v531_v19  ;;  %v473_v27 = vand.u32 %v471_v16, %v462_v20  ;;  %v476_v28 = vand.u32 %v471_v16, %v463_v21  ;;  %v1329_v31 = vld [vmem:[#allocation2 + $0x60] sm:$0xf]  ;;  %v1540_v36 = vld [vmem:[#allocation2 + $0x54] sm:$0xf]  ;;  %v1322_v37 = vor.u32 %v1541_v35, %v1321_v34  ;;  %v1323_v38 = vld [vmem:[#allocation2 + $0x58] sm:$0xf0] }
  0x1a   : > { %v1330_v33 = vor.u32 %v1543_v32, %v1329_v31  ;;  %v1326_v39 = vor.u32 %v1540_v36, %v1323_v38  ;;  %v1313_v40 = vld [vmem:[#allocation2 + $0x40] sm:$0xf]  ;;  %v1539_v41 = vld [vmem:[#allocation2 + $0x44] sm:$0xf0]  ;;  %v1538_v42 = vld [vmem:[#allocation2 + $0x44] sm:$0xf] }
  0x1b   : > { %485 = vmatpush.bf16.msra.mxu0 %v473_v27  ;;  %499 = vmatpush.bf16.msra.mxu1 %v476_v28  ;;  %v1314_v43 = vor.u32 %v1539_v41, %v1313_v40  ;;  %v1315_v44 = vld [vmem:[#allocation2 + $0x48] sm:$0xf0]  ;;  %v1305_v46 = vld [vmem:[#allocation2 + $0x30] sm:$0xf]  ;;  %v1537_v47 = vld [vmem:[#allocation2 + $0x34] sm:$0xf0] }
  0x1c   : > { %763 = vmatpush.bf16.msrb.mxu2 %v1342_v22  ;;  %1278 = vmatmul.msk.bf16.vlgmr.msra.gmra.mxu3 %vm519_vm4, %v1526_v25  ;;  %v1318_v45 = vor.u32 %v1538_v42, %v1315_v44  ;;  %v1306_v48 = vor.u32 %v1537_v47, %v1305_v46  ;;  %v1369_v49 = vld [vmem:[#allocation2 + $0xb0] sm:$0xf]  ;;  %v1553_v50 = vld [vmem:[#allocation2 + $0xb4] sm:$0xf0]  ;;  %v1536_v51 = vld [vmem:[#allocation2 + $0x34] sm:$0xf] }
  0x1d   : > { %1277 = vmatmul.msk.bf16.vlgmr.msra.gmra.mxu2 %vm519_vm4, %v1526_v25  ;;  %v1370_v52 = vor.u32 %v1553_v50, %v1369_v49  ;;  %v1307_v53 = vld [vmem:[#allocation2 + $0x38] sm:$0xf0]  ;;  %v1552_v54 = vld [vmem:[#allocation2 + $0xb4] sm:$0xf]  ;;  %v1297_v58 = vld [vmem:[#allocation2 + $0x20] sm:$0xf] }
  0x1e   : > { %1263 = vmatmul.msk.bf16.vlgmr.msra.gmra.mxu0 %vm464_vm5, %v1529_v30  ;;  %1264 = vmatmul.msk.bf16.vlgmr.msra.gmra.mxu1 %vm464_vm5, %v1529_v30  ;;  %v1371_v55 = vld [vmem:[#allocation2 + $0xb8] sm:$0xf0]  ;;  %v1310_v56 = vor.u32 %v1536_v51, %v1307_v53  ;;  %v1535_v59 = vld [vmem:[#allocation2 + $0x24] sm:$0xf0]  ;;  %v1361_v60 = vld [vmem:[#allocation2 + $0xa0] sm:$0xf] }
  0x1f   : > { %735 = vmatpush.bf16.msrb.mxu0 %v1338_v26  ;;  %v1374_v57 = vor.u32 %v1552_v54, %v1371_v55  ;;  %753 = vmatpush.bf16.msrb.mxu1 %v1370_v52  ;;  %v1298_v61 = vor.u32 %v1535_v59, %v1297_v58  ;;  %v1551_v62 = vld [vmem:[#allocation2 + $0xa4] sm:$0xf0]  ;;  %v1534_v63 = vld [vmem:[#allocation2 + $0x24] sm:$0xf]  ;;  %v1299_v0 = vld [vmem:[#allocation2 + $0x28] sm:$0xf0] }
  0x20   : > { %764 = vmatpush.bf16.msrb.mxu2 %v1334_v29  ;;  %v1362_v1 = vor.u32 %v1551_v62, %v1361_v60  ;;  %v1302_v2 = vor.u32 %v1534_v63, %v1299_v0  ;;  %v1550_v3 = vld [vmem:[#allocation2 + $0xa4] sm:$0xf]  ;;  %v1363_v4 = vld [vmem:[#allocation2 + $0xa8] sm:$0xf0]  ;;  %v1289_v6 = vld [vmem:[#allocation2 + $0x10] sm:$0xf] }
  0x21   : > { %781 = vmatpush.bf16.msrb.mxu3 %v1374_v57  ;;  %v1366_v5 = vor.u32 %v1550_v3, %v1363_v4  ;;  %v1533_v7 = vld [vmem:[#allocation2 + $0x14] sm:$0xf0]  ;;  %v1353_v8 = vld [vmem:[#allocation2 + $0x90] sm:$0xf]  ;;  %v1532_v11 = vld [vmem:[#allocation2 + $0x14] sm:$0xf] }
  0x22   : > { %v1290_v9 = vor.u32 %v1533_v7, %v1289_v6  ;;  %v1549_v10 = vld [vmem:[#allocation2 + $0x94] sm:$0xf0]  ;;  %v1291_v12 = vld [vmem:[#allocation2 + $0x18] sm:$0xf0]  ;;  %v1548_v15 = vld [vmem:[#allocation2 + $0x94] sm:$0xf] }
  0x23   : > { %736 = vmatpush.bf16.msrb.mxu0 %v1330_v33  ;;  %754 = vmatpush.bf16.msrb.mxu1 %v1362_v1  ;;  %v1354_v13 = vor.u32 %v1549_v10, %v1353_v8  ;;  %v1294_v14 = vor.u32 %v1532_v11, %v1291_v12  ;;  %v1355_v16 = vld [vmem:[#allocation2 + $0x98] sm:$0xf0]  ;;  %v1281_v18 = vld [vmem:[#allocation2] sm:$0xf]  ;;  %v1531_v19 = vld [vmem:[#allocation2 + $0x4] sm:$0xf0] }
  0x24   : > { %765 = vmatpush.bf16.msrb.mxu2 %v1326_v39  ;;  %v1358_v17 = vor.u32 %v1548_v15, %v1355_v16  ;;  %v1345_v20 = vld [vmem:[#allocation2 + $0x80] sm:$0xf]  ;;  %v1282_v21 = vor.u32 %v1531_v19, %v1281_v18  ;;  %v1547_v22 = vld [vmem:[#allocation2 + $0x84] sm:$0xf0]  ;;  %v1530_v23 = vld [vmem:[#allocation2 + $0x4] sm:$0xf] }
  0x25   : > { %782 = vmatpush.bf16.msrb.mxu3 %v1366_v5  ;;  %v1283_v24 = vld [vmem:[#allocation2 + $0x8] sm:$0xf0]  ;;  %v1346_v25 = vor.u32 %v1547_v22, %v1345_v20  ;;  %v1546_v27 = vld [vmem:[#allocation2 + $0x84] sm:$0xf]  ;;  %v1435_v30 = vld [vmem:[#allocation4 + $0x70] sm:$0xf] }
  0x26   : > { %v1286_v26 = vor.u32 %v1530_v23, %v1283_v24  ;;  %v1347_v28 = vld [vmem:[#allocation2 + $0x88] sm:$0xf0]  ;;  %v1569_v31 = vld [vmem:[#allocation4 + $0x74] sm:$0xf0]  ;;  %v1568_v32 = vld [vmem:[#allocation4 + $0x74] sm:$0xf] }
  0x27   : > { %737 = vmatpush.bf16.msrb.mxu0 %v1322_v37  ;;  %755 = vmatpush.bf16.msrb.mxu1 %v1354_v13  ;;  %v1350_v29 = vor.u32 %v1546_v27, %v1347_v28  ;;  %v1436_v33 = vor.u32 %v1569_v31, %v1435_v30  ;;  %v1437_v34 = vld [vmem:[#allocation4 + $0x78] sm:$0xf0]  ;;  %v1427_v35 = vld [vmem:[#allocation4 + $0x60] sm:$0xf]  ;;  %v1567_v36 = vld [vmem:[#allocation4 + $0x64] sm:$0xf0] }
  0x28   : > { %766 = vmatpush.bf16.msrb.mxu2 %v1318_v45  ;;  %v1440_v37 = vor.u32 %v1568_v32, %v1437_v34  ;;  %v1566_v38 = vld [vmem:[#allocation4 + $0x64] sm:$0xf]  ;;  %v1429_v39 = vld [vmem:[#allocation4 + $0x68] sm:$0xf0]  ;;  %v1428_v40 = vor.u32 %v1567_v36, %v1427_v35  ;;  %v1419_v42 = vld [vmem:[#allocation4 + $0x50] sm:$0xf] }
  0x29   : > { %783 = vmatpush.bf16.msrb.mxu3 %v1358_v17  ;;  %v1432_v41 = vor.u32 %v1566_v38, %v1429_v39  ;;  %v1564_v44 = vld [vmem:[#allocation4 + $0x54] sm:$0xf]  ;;  %v1421_v45 = vld [vmem:[#allocation4 + $0x58] sm:$0xf0]  ;;  %v561_v51 = vld [vmem:[%s1889_s4] sm:$0x3] }
  0x2a   : > { %v1424_v47 = vor.u32 %v1564_v44, %v1421_v45  ;;  %v563_v54 = vperm.slane %v561_v51, 0  ;;  %vm731_vm6 = vcmask 523264   ;;  %v1411_v13 = vld [vmem:[#allocation4 + $0x40] sm:$0xf]  ;;  %v1562_v15 = vld [vmem:[#allocation4 + $0x44] sm:$0xf] }
  0x2b   : > { %738 = vmatpush.bf16.msrb.mxu0 %v1314_v43  ;;  %756 = vmatpush.bf16.msrb.mxu1 %v1346_v25  ;;  %v1565_v43 = vld [vmem:[#allocation4 + $0x54] sm:$0xf0]  ;;  %v1413_v17 = vld [vmem:[#allocation4 + $0x48] sm:$0xf0]  ;;  %v1403_v19 = vld [vmem:[#allocation4 + $0x30] sm:$0xf] }
  0x2c   : > { %767 = vmatpush.bf16.msrb.mxu2 %v1310_v56  ;;  %v1420_v46 = vor.u32 %v1565_v43, %v1419_v42  ;;  %v564_v56 = vperm.slane %v561_v51, 1  ;;  %v1416_v18 = vor.u32 %v1562_v15, %v1413_v17  ;;  %v1561_v20 = vld [vmem:[#allocation4 + $0x34] sm:$0xf0]  ;;  %v1405_v23 = vld [vmem:[#allocation4 + $0x38] sm:$0xf0]  ;;  %vm1151_vm7 = vcmask 23552  }
  0x2d   : > { %784 = vmatpush.bf16.msrb.mxu3 %v1350_v29  ;;  %v1404_v22 = vor.u32 %v1561_v20, %v1403_v19  ;;  %v1395_v25 = vld [vmem:[#allocation4 + $0x20] sm:$0xf]  ;;  %v1558_v28 = vld [vmem:[#allocation4 + $0x24] sm:$0xf]  ;;  %v1397_v29 = vld [vmem:[#allocation4 + $0x28] sm:$0xf0] }
  0x2e   : > { %v1400_v30 = vor.u32 %v1558_v28, %v1397_v29  ;;  %v1467_v31 = vld [vmem:[#allocation4 + $0xb0] sm:$0xf]  ;;  %v1577_v32 = vld [vmem:[#allocation4 + $0xb4] sm:$0xf0]  ;;  %v1469_v35 = vld [vmem:[#allocation4 + $0xb8] sm:$0xf0] }
  0x2f   : > { %739 = vmatpush.bf16.msrb.mxu0 %v1306_v48  ;;  %954 = vmatpush.bf16.msra.mxu1 %v1436_v33  ;;  %v1576_v33 = vld [vmem:[#allocation4 + $0xb4] sm:$0xf]  ;;  %v1468_v34 = vor.u32 %v1577_v32, %v1467_v31  ;;  %v1557_v38 = vld [vmem:[#allocation4 + $0x14] sm:$0xf0]  ;;  %v1459_v43 = vld [vmem:[#allocation4 + $0xa0] sm:$0xf] }
  0x30   : > { %768 = vmatpush.bf16.msrb.mxu2 %v1302_v2  ;;  %v1472_v36 = vor.u32 %v1576_v33, %v1469_v35  ;;  %v1556_v39 = vld [vmem:[#allocation4 + $0x14] sm:$0xf]  ;;  %v1575_v44 = vld [vmem:[#allocation4 + $0xa4] sm:$0xf0]  ;;  %v1574_v45 = vld [vmem:[#allocation4 + $0xa4] sm:$0xf] }
  0x31   : > { %972 = vmatpush.bf16.msra.mxu3 %v1468_v34  ;;  %v1554_v51 = vld [vmem:[#allocation4 + $0x4] sm:$0xf]  ;;  %v1584_v33 = vld [vmem:[%s1894_s9 + $0x30] sm:$0xff]  ;;  %v1583_v34 = vld [vmem:[%s1894_s9 + $0x28] sm:$0xff] }
  0x32   : > { %v1582_v35 = vld [vmem:[%s1894_s9 + $0x20] sm:$0xff] }
  0x33   : > { %740 = vmatpush.bf16.msrb.mxu0 %v1298_v61  ;;  %955 = vmatpush.bf16.msra.mxu1 %v1428_v40 }
  0x34   : > { %769 = vmatpush.bf16.msrb.mxu2 %v1294_v14  ;;  %v1563_v14 = vld [vmem:[#allocation4 + $0x44] sm:$0xf0] }
  0x35   : > { %v1412_v16 = vor.u32 %v1563_v14, %v1411_v13 }
  0x37   : > { %741 = vmatpush.bf16.msrb.mxu0 %v1290_v9  ;;  %956 = vmatpush.bf16.msra.mxu1 %v1420_v46  ;;  %v1460_v46 = vor.u32 %v1575_v44, %v1459_v43  ;;  %v1586_v43 = vld [vmem:[%s1894_s9 + $0x40] sm:$0xff] }
  0x38   : > { %770 = vmatpush.bf16.msrb.mxu2 %v1286_v26  ;;  %v1559_v26 = vld [vmem:[#allocation4 + $0x24] sm:$0xf0] }
  0x39   : > { %v1396_v27 = vor.u32 %v1559_v26, %v1395_v25  ;;  %973 = vmatpush.bf16.msra.mxu3 %v1460_v46  ;;  %v825_v46 = vld [vmem:[%s1893_s8] sm:$0x3] }
  0x3b   : > { %742 = vmatpush.bf16.msrb.mxu0 %v1282_v21  ;;  %957 = vmatpush.bf16.msra.mxu1 %v1412_v16  ;;  %v1560_v21 = vld [vmem:[#allocation4 + $0x34] sm:$0xf] }
  0x3c   : > { %v1408_v24 = vor.u32 %v1560_v21, %v1405_v23  ;;  %1000 = vmatpush.bf16.msra.mxu2 %v1472_v36  ;;  %v1581_v36 = vld [vmem:[%s1894_s9 + $0x18] sm:$0xff] }
  0x3f   : > { %982 = vmatpush.bf16.msra.mxu0 %v1440_v37  ;;  %958 = vmatpush.bf16.msra.mxu1 %v1404_v22  ;;  %v1387_v37 = vld [vmem:[#allocation4 + $0x10] sm:$0xf] }
  0x40   : > { %v1388_v40 = vor.u32 %v1557_v38, %v1387_v37  ;;  %v1589_v37 = vld [vmem:[%s1894_s9 + $0x58] sm:$0xff]  ;;  %v1580_v38 = vld [vmem:[%s1894_s9 + $0x10] sm:$0xff] }
  0x43   : > { %983 = vmatpush.bf16.msra.mxu0 %v1432_v41  ;;  %959 = vmatpush.bf16.msra.mxu1 %v1396_v27  ;;  %v1389_v41 = vld [vmem:[#allocation4 + $0x18] sm:$0xf0] }
  0x44   : > { %v1392_v42 = vor.u32 %v1556_v39, %v1389_v41  ;;  %v1588_v39 = vld [vmem:[%s1894_s9 + $0x50] sm:$0xff]  ;;  %v1587_v41 = vld [vmem:[%s1894_s9 + $0x48] sm:$0xff] }
  0x47   : > { %984 = vmatpush.bf16.msra.mxu0 %v1424_v47  ;;  %960 = vmatpush.bf16.msra.mxu1 %v1388_v40  ;;  %v1461_v47 = vld [vmem:[#allocation4 + $0xa8] sm:$0xf0] }
  0x48   : > { %v1579_v40 = vld [vmem:[%s1894_s9 + $0x8] sm:$0xff] }
  0x4b   : > { %985 = vmatpush.bf16.msra.mxu0 %v1416_v18 }
  0x4f   : > { %986 = vmatpush.bf16.msra.mxu0 %v1408_v24 }
  0x53   : > { %987 = vmatpush.bf16.msra.mxu0 %v1400_v30 }
  0x57   : > { %988 = vmatpush.bf16.msra.mxu0 %v1392_v42  ;;  %v1578_v42 = vld [vmem:[%s1894_s9] sm:$0xff] }
  0x9b   : > { %v487_v48 = vpop.f32.mrf.mxu0  ;;  %v501_v49 = vpop.f32.mrf.mxu1 }
  0x9f   : > { %v556_v52 = vpop.f32.mrf.mxu3 }
  0xa0   : > { %v542_v50 = vpop.f32.mrf.mxu2  ;;  %v557_v55 = vadd.f32 %v556_v52, %v501_v49  ;;  %v1379_v49 = vld [vmem:[#allocation4] sm:$0xf] }
  0xa1   : > { %v543_v53 = vadd.f32 %v542_v50, %v487_v48  ;;  %v1464_v48 = vor.u32 %v1574_v45, %v1461_v47  ;;  %v1555_v50 = vld [vmem:[#allocation4 + $0x4] sm:$0xf0]  ;;  %v827_v47 = vperm.slane %v825_v46, 0 }
  0xa2   : > { %v568_v58 = vadd.f32 %v564_v56, %v557_v55  ;;  %v1380_v52 = vor.u32 %v1555_v50, %v1379_v49  ;;  %v1451_v55 = vld [vmem:[#allocation4 + $0x90] sm:$0xf] }
  0xa3   : > { %v567_v57 = vadd.f32 %v563_v54, %v543_v53  ;;  %v489_v59 = vpop.f32.mrf.mxu0  ;;  %v503_v60 = vpop.f32.mrf.mxu1  ;;  %v1381_v53 = vld [vmem:[#allocation4 + $0x8] sm:$0xf0]  ;;  %1001 = vmatpush.bf16.msra.mxu2 %v1464_v48  ;;  %v828_v48 = vperm.slane %v825_v46, 1 }
  0xa4   : > { %v572_v2 = vmul.f32 0.01, %v568_v58  ;;  %961 = vmatpush.bf16.msra.mxu1 %v1380_v52 }
  0xa5   : > { %v571_v1 = vmul.f32 0.01, %v567_v57 }
  0xa6   : > { %v576_v8 = vmax.f32 %v568_v58, %v572_v2 }
  0xa7   : > { %v558_v62 = vpop.f32.mrf.mxu3  ;;  %v575_v7 = vmax.f32 %v567_v57, %v571_v1  ;;  %v1572_v57 = vld [vmem:[#allocation4 + $0x94] sm:$0xf]  ;;  %v1445_v1 = vld [vmem:[#allocation4 + $0x88] sm:$0xf0] }
  0xa8   : > { %v544_v61 = vpop.f32.mrf.mxu2  ;;  %v559_v0 = vadd.f32 %v558_v62, %v503_v60  ;;  %v1571_v62 = vld [vmem:[#allocation4 + $0x84] sm:$0xf0] }
  0xa9   : > { %v545_v63 = vadd.f32 %v544_v61, %v489_v59  ;;  %v1453_v59 = vld [vmem:[#allocation4 + $0x98] sm:$0xf0]  ;;  %v1443_v61 = vld [vmem:[#allocation4 + $0x80] sm:$0xf] }
  0xaa   : > { %v570_v4 = vadd.f32 %v564_v56, %v559_v0  ;;  %v1573_v56 = vld [vmem:[#allocation4 + $0x94] sm:$0xf0]  ;;  %v1456_v60 = vor.u32 %v1572_v57, %v1453_v59  ;;  %v1444_v0 = vor.u32 %v1571_v62, %v1443_v61 }
  0xab   : > { %v569_v3 = vadd.f32 %v563_v54, %v545_v63  ;;  %v1384_v54 = vor.u32 %v1554_v51, %v1381_v53  ;;  %v1452_v58 = vor.u32 %v1573_v56, %v1451_v55  ;;  %v1570_v63 = vld [vmem:[#allocation4 + $0x84] sm:$0xf] }
  0xac   : > { %v574_v6 = vmul.f32 0.01, %v570_v4  ;;  %1002 = vmatpush.bf16.msra.mxu2 %v1456_v60  ;;  %v1448_v2 = vor.u32 %v1570_v63, %v1445_v1 }
  0xad   : > { %v573_v5 = vmul.f32 0.01, %v569_v3  ;;  %989 = vmatpush.bf16.msra.mxu0 %v1384_v54  ;;  %974 = vmatpush.bf16.msra.mxu3 %v1452_v58 }
  0xae   : > { %v578_v10 = vmax.f32 %v570_v4, %v574_v6  ;;  %v605_v4 = vld [vmem:[%s1891_s6] sm:$0x3] }
  0xaf   : > { %v577_v9 = vmax.f32 %v569_v3, %v573_v5  ;;  %v1585_v3 = vld [vmem:[%s1894_s9 + $0x38] sm:$0xff]  ;;  %v607_v5 = vperm.slane %v605_v4, 0 }
  0xb0   : > { %v580_v11 = vpack.c.bf16 %v578_v10, %v576_v8  ;;  %1003 = vmatpush.bf16.msra.mxu2 %v1448_v2 }
  0xb1   : > { %v579_v12 = vpack.c.bf16 %v577_v9, %v575_v7  ;;  %975 = vmatpush.bf16.msra.mxu3 %v1444_v0  ;;  %v608_v9 = vperm.slane %v605_v4, 1 }
  0xb2   : > { %1375 = vmatmul.msk.bf16.vlgmr.msrb.gmra.mxu1 %vm731_vm6, %v580_v11  ;;  %1376 = vmatmul.msk.bf16.vlgmr.msrb.gmra.mxu3 %vm731_vm6, %v580_v11 }
  0xb3   : > { %743 = vmatmul.bf16.vlgmr.msrb.gmra.mxu0 %v579_v12  ;;  %771 = vmatmul.bf16.vlgmr.msrb.gmra.mxu2 %v579_v12 }
  0xb4   : > { %1141 = vmatpush.bf16.msrb.mxu1 %v1589_v37 }
  0xb5   : > { %1123 = vmatpush.bf16.msrb.mxu3 %v1585_v3 }
  0xb8   : > { %1142 = vmatpush.bf16.msrb.mxu1 %v1588_v39 }
  0xb9   : > { %1124 = vmatpush.bf16.msrb.mxu3 %v1584_v33 }
  0xbc   : > { %1143 = vmatpush.bf16.msrb.mxu1 %v1587_v41 }
  0xbd   : > { %1125 = vmatpush.bf16.msrb.mxu3 %v1583_v34 }
  0xc0   : > { %1144 = vmatpush.bf16.msrb.mxu1 %v1586_v43 }
  0xc1   : > { %1126 = vmatpush.bf16.msrb.mxu3 %v1582_v35 }
  0xc5   : > { %1127 = vmatpush.bf16.msrb.mxu3 %v1581_v36 }
  0xc9   : > { %1128 = vmatpush.bf16.msrb.mxu3 %v1580_v38 }
  0xcd   : > { %1129 = vmatpush.bf16.msrb.mxu3 %v1579_v40 }
  0xd1   : > { %1130 = vmatpush.bf16.msrb.mxu3 %v1578_v42 }
 0x12f   : > { %v758_v7 = vpop.f32.mrf.mxu1 }
 0x130   : > { %v744_v6 = vpop.f32.mrf.mxu0 }
 0x131   : > { %v745_v8 = vadd.f32 %v744_v6, %v607_v5 }
 0x133   : > { %v759_v10 = vadd.f32 %v758_v7, %v745_v8 }
 0x135   : > { %v786_v12 = vpop.f32.mrf.mxu3  ;;  %v791_v17 = vmul.f32 0.01, %v759_v10 }
 0x136   : > { %v772_v11 = vpop.f32.mrf.mxu2 }
 0x137   : > { %v773_v15 = vadd.f32 %v772_v11, %v608_v9  ;;  %v760_v16 = vpop.f32.mrf.mxu1  ;;  %v795_v21 = vmax.f32 %v759_v10, %v791_v17 }
 0x138   : > { %v746_v13 = vpop.f32.mrf.mxu0 }
 0x139   : > { %v747_v14 = vadd.f32 %v746_v13, %v607_v5  ;;  %v787_v20 = vadd.f32 %v786_v12, %v773_v15 }
 0x13b   : > { %v761_v18 = vadd.f32 %v760_v16, %v747_v14  ;;  %v792_v27 = vmul.f32 0.01, %v787_v20 }
 0x13d   : > { %v793_v19 = vmul.f32 0.01, %v761_v18  ;;  %v788_v26 = vpop.f32.mrf.mxu3  ;;  %v796_v30 = vmax.f32 %v787_v20, %v792_v27 }
 0x13e   : > { %v774_v23 = vpop.f32.mrf.mxu2 }
 0x13f   : > { %v797_v22 = vmax.f32 %v761_v18, %v793_v19  ;;  %v775_v24 = vadd.f32 %v774_v23, %v608_v9  ;;  %v1622_v9 = vld [vmem:[%s1895_s10] ss:$0 sm:$0xff] }
 0x141   : > { %v799_v25 = vpack.c.bf16 %v797_v22, %v795_v21  ;;  %v789_v28 = vadd.f32 %v788_v26, %v775_v24 }
 0x143   : > { %962 = vmatmul.bf16.vlgmr.msra.gmra.mxu1 %v799_v25  ;;  %990 = vmatmul.bf16.vlgmr.msra.gmra.mxu0 %v799_v25  ;;  %v794_v29 = vmul.f32 0.01, %v789_v28 }
 0x145   : > { %v798_v31 = vmax.f32 %v789_v28, %v794_v29 }
 0x147   : > { %v800_v32 = vpack.c.bf16 %v798_v31, %v796_v30 }
 0x149   : > { %1473 = vmatmul.msk.bf16.vlgmr.msra.gmra.mxu3 %vm731_vm6, %v800_v32  ;;  %1474 = vmatmul.msk.bf16.vlgmr.msra.gmra.mxu2 %vm731_vm6, %v800_v32 }
 0x1c0   : > { %v963_v44 = vpop.f32.mrf.mxu1  ;;  %v991_v45 = vpop.f32.mrf.mxu0 }
 0x1c1   : > { %v964_v51 = vadd.f32 %v963_v44, %v827_v47  ;;  %v992_v52 = vadd.f32 %v991_v45, %v828_v48 }
 0x1c8   : > { %v965_v53 = vpop.f32.mrf.mxu1  ;;  %v993_v54 = vpop.f32.mrf.mxu0 }
 0x1c9   : > { %v966_v57 = vadd.f32 %v965_v53, %v827_v47  ;;  %v994_v58 = vadd.f32 %v993_v54, %v828_v48 }
 0x1cc   : > { %v977_v49 = vpop.f32.mrf.mxu3  ;;  %v1005_v50 = vpop.f32.mrf.mxu2 }
 0x1cd   : > { %v978_v55 = vadd.f32 %v977_v49, %v964_v51  ;;  %v1006_v56 = vadd.f32 %v1005_v50, %v992_v52 }
 0x1cf   : > { %v1010_v61 = vmul.f32 0.01, %v978_v55  ;;  %v1011_v62 = vmul.f32 0.01, %v1006_v56 }
 0x1d1   : > { %v1014_v3 = vmax.f32 %v978_v55, %v1010_v61  ;;  %v1015_v4 = vmax.f32 %v1006_v56, %v1011_v62 }
 0x1d4   : > { %v979_v59 = vpop.f32.mrf.mxu3  ;;  %v1007_v60 = vpop.f32.mrf.mxu2 }
 0x1d5   : > { %v980_v63 = vadd.f32 %v979_v59, %v966_v57  ;;  %v1008_v0 = vadd.f32 %v1007_v60, %v994_v58 }
 0x1d7   : > { %v1012_v1 = vmul.f32 0.01, %v980_v63  ;;  %v1013_v2 = vmul.f32 0.01, %v1008_v0 }
 0x1d9   : > { %v1016_v5 = vmax.f32 %v980_v63, %v1012_v1  ;;  %v1017_v6 = vmax.f32 %v1008_v0, %v1013_v2 }
 0x1db   : > { %v1018_v7 = vpack.c.bf16 %v1016_v5, %v1014_v3  ;;  %v1019_v8 = vpack.c.bf16 %v1017_v6, %v1015_v4 }
 0x1dd   : > { %1131 = vmatmul.bf16.vlgmr.msrb.gmra.mxu3 %v1018_v7  ;;  %1523 = vmatmul.msk.bf16.vlgmr.msrb.gmra.mxu1 %vm731_vm6, %v1019_v8 }
 0x25a   : > { %v1146_v10 = vpop.f32.mrf.mxu1 }
 0x260   : > { %v1132_v11 = vpop.f32.mrf.mxu3 }
 0x261   : > { %v1133_v12 = vadd.f32 %v1622_v9, %v1132_v11 }
 0x262   : > { %v1148_v16 = vpop.f32.mrf.mxu1 }
 0x263   : > { %v1147_v13 = vadd.f32 %v1146_v10, %v1133_v12 }
 0x265   : > { %1152 = vst.msk [vmem:[%s444_s16] sm:$0xff] %vm1151_vm7, %v1147_v13 }
 0x268   : > { %v1134_v14 = vpop.f32.mrf.mxu3 }
 0x269   : > { %v1135_v15 = vadd.f32 %v1622_v9, %v1134_v14 }
 0x26b   : > { %v1149_v17 = vadd.f32 %v1148_v16, %v1135_v15 }
 0x26d   : > { %1153 = vst.msk [vmem:[%s444_s16 + $0x8] sm:$0xff] %vm1151_vm7, %v1149_v17 }
 0x26e PF: > { %s23_s17 = sadd.s32 1, %s1697_s17  }
 0x26f   : > { %p20_p7 = scmp.ge.s32.totalorder %s23_s17, 4  }
 0x271   :  { %22 = sbr.rel (!%p20_p7) target bundleno = 2 (0x2), region = 106 }
 0x276   :  { %1176 = vsyncpa [#allocation3], 1 }
 0x277   :  { %1178 = vsyncpa [#allocation3 + $0x1], 1 }
 0x278   :  { %1179 = vsyncpa [#allocation5], 1 }

</bundles_post_ra>
